<compile_context>
chip_gen: v7x
topology: tpu7x:2x2x1
jax: 0.10.0
libtpu: 0.0.40
codegen_flags: <defaults>
</compile_context>

<pallas_src>
import math

import jax
import jax.numpy as jnp
from jax.experimental import pallas as pl
from jax.experimental.pallas import tpu as pltpu

# ---- small, TPU-friendly shapes consistent with the module's forward ----
B, S, H = 2, 16, 128          # batch, seq_len, hidden_size (scaled from 768)
NH, DH = 2, 64                # attention heads, head dim (scaled from 12x64)
MID = 128                     # mid_size (scaled from 512)
NCLS = 2
LPAD = 128                    # lane-padded logits width
VOCAB = 100
BN_EPS = 1e-5


def _coattn_mdp_kernel(
    q_in_ref,                               # (2B, H)    bf16  [src CLS rows; tgt CLS rows]
    kv_in_ref,                              # (2B*S, H)  bf16  [tgt hidden; src hidden] (keys/values)
    maskbias_ref,                           # (2B, S)    f32   -10000*(1-mask), module's mask-broadcast quirk
    wq_ref, bq_ref,                         # (H, H) bf16, (1, H) f32
    wkv_ref, bkv_ref,                       # (H, 2H) bf16, (1, 2H) f32   (K|V fused lane-wise)
    w1_ref, b1_ref,                         # (3H, H) bf16, (1, H) f32    (BN1 folded in)
    w2_ref, b2_ref,                         # (H, MID) bf16, (1, MID) f32 (BN2 folded in)
    w3_ref, b3_ref,                         # (MID, LPAD) bf16, (1, LPAD) f32 (lane-padded head)
    out_ref,                                # (B, LPAD) f32  lane-padded logits
):
    # ---- projections (MXU, bf16 operands, f32 accumulate) -------------------
    # Only the CLS (position 0) query rows are consumed downstream, so Q runs
    # on just the 2B CLS rows. K/V run over both full context sequences with
    # the K and V weights fused along lanes (one 256-wide MXU pass).
    # Batch layout: rows [0, B) = source-query direction (keys/values = target),
    #               rows [B, 2B) = target-query direction (keys/values = source).
    q = jnp.dot(q_in_ref[...], wq_ref[...],
                preferred_element_type=jnp.float32) + bq_ref[...]          # (2B, H)
    kv = jnp.dot(kv_in_ref[...], wkv_ref[...],
                 preferred_element_type=jnp.float32) + bkv_ref[...]        # (2B*S, 2H)
    k = kv[:, :H].reshape(2 * B, S, H)
    v = kv[:, H:].reshape(2 * B, S, H)

    # ---- query-length-1 multi-head attention (VPU mul + XLU reduce) ---------
    scale = 1.0 / math.sqrt(DH)
    bias = maskbias_ref[...]                                               # (2B, S)
    qk = q[:, None, :] * k                                                 # (2B, S, H) f32
    ctx_heads = []
    for h in range(NH):                     # NH = 2, static unroll
        lo = h * DH
        s_h = jnp.sum(qk[:, :, lo:lo + DH], axis=-1) * scale + bias        # (2B, S)
        m_h = jnp.max(s_h, axis=-1, keepdims=True)
        e_h = jnp.exp(s_h - m_h)
        inv_l = pl.reciprocal(jnp.sum(e_h, axis=-1, keepdims=True), approx=True)
        p_h = e_h * inv_l                                                  # softmax over keys
        ctx_heads.append(jnp.sum(p_h[:, :, None] * v[:, :, lo:lo + DH], axis=1))  # (2B, DH)
    ctx = jnp.concatenate(ctx_heads, axis=-1)                              # (2B, H)

    s_cls = ctx[:B]                          # source_coattention_embedding
    t_cls = ctx[B:]                          # target_coattention_embedding
    feat = jnp.concatenate([s_cls, t_cls, jnp.abs(s_cls - t_cls)], axis=-1)  # (B, 3H)

    # ---- classifier (BN folded into weights; 5-way MSD is identity in eval) --
    h1 = jnp.dot(feat.astype(jnp.bfloat16), w1_ref[...],
                 preferred_element_type=jnp.float32) + b1_ref[...]
    h1 = jnp.maximum(h1, 0.0)
    h2 = jnp.dot(h1.astype(jnp.bfloat16), w2_ref[...],
                 preferred_element_type=jnp.float32) + b2_ref[...]
    h2 = jnp.maximum(h2, 0.0)
    # lane-dense (B, 128) store; real logits live in lanes [0, NCLS)
    out_ref[...] = jnp.dot(h2.astype(jnp.bfloat16), w3_ref[...],
                           preferred_element_type=jnp.float32) + b3_ref[...]


@jax.jit
def sbert_coattn_forward(src_hidden, tgt_hidden, src_ids, tgt_ids, params):
    f32, bf16 = jnp.float32, jnp.bfloat16

    # attention masks (torch.ne(ids, 0)) -> additive bias, both directions
    # stacked.  NOTE: the module applies the *query-side* mask over key
    # positions (mask-broadcast quirk); replicated faithfully here.
    src_mask = (src_ids != 0).astype(f32)
    tgt_mask = (tgt_ids != 0).astype(f32)
    maskbias = jnp.concatenate([1.0 - src_mask, 1.0 - tgt_mask], axis=0) * -10000.0

    # pre-stack kernel inputs in the wrapper (layout plumbing, not compute)
    src_bf = src_hidden.astype(bf16)
    tgt_bf = tgt_hidden.astype(bf16)
    q_in = jnp.concatenate([src_bf[:, 0, :], tgt_bf[:, 0, :]], axis=0)          # (2B, H)
    kv_in = jnp.concatenate([tgt_bf, src_bf], axis=0).reshape(2 * B * S, H)     # (2B*S, H)

    # fuse K|V weights lane-wise
    wkv = jnp.concatenate([params["wk"], params["wv"]], axis=1).astype(bf16)
    bkv = jnp.concatenate([params["bk"], params["bv"]], axis=1)

    # fold eval-mode BatchNorm1d into the preceding Linear layers (f32 fold,
    # then one bf16 cast — same rounding budget as casting the raw weights)
    scale1 = params["bn1_gamma"] * jax.lax.rsqrt(params["bn1_var"] + BN_EPS)
    w1f = (params["w1"] * scale1).astype(bf16)
    b1f = (params["b1"] - params["bn1_mean"]) * scale1 + params["bn1_beta"]
    scale2 = params["bn2_gamma"] * jax.lax.rsqrt(params["bn2_var"] + BN_EPS)
    w2f = (params["w2"] * scale2).astype(bf16)
    b2f = (params["b2"] - params["bn2_mean"]) * scale2 + params["bn2_beta"]

    # pad the 2-class head to 128 lanes (unmasked lane-dense store)
    w3p = jnp.zeros((MID, LPAD), f32).at[:, :NCLS].set(params["w3"]).astype(bf16)
    b3p = jnp.zeros((1, LPAD), f32).at[:, :NCLS].set(params["b3"])

    args = (
        q_in, kv_in, maskbias,
        params["wq"].astype(bf16), params["bq"],
        wkv, bkv,
        w1f, b1f,
        w2f, b2f,
        w3p, b3p,
    )

    flops = 2 * (2 * B * S * H * 2 * H      # fused K/V projection
                 + 2 * B * H * H            # CLS-row Q projection
                 + 2 * 2 * B * S * H        # attention matvecs
                 + B * 3 * H * H + B * H * MID + B * MID * LPAD)   # classifier
    bytes_accessed = sum(int(a.size) * a.dtype.itemsize for a in args) + B * LPAD * 4

    out = pl.pallas_call(
        _coattn_mdp_kernel,
        out_shape=jax.ShapeDtypeStruct((B, LPAD), jnp.float32),
        cost_estimate=pl.CostEstimate(
            flops=flops, transcendentals=2 * B * NH * S, bytes_accessed=bytes_accessed),
    )(*args)

    logits = out[:, :NCLS]
    probs = jax.nn.softmax(logits, axis=-1)      # tiny 2-wide softmax: do it in XLA
    return logits, probs


def reference_forward(src_hidden, tgt_hidden, src_ids, tgt_ids, p):
    """Pure-JAX f32 reference with the full (all-query-rows) co-attention."""
    def coattn(ctx_states, qry_states, mask):
        q = qry_states @ p["wq"] + p["bq"]
        k = ctx_states @ p["wk"] + p["bk"]
        v = ctx_states @ p["wv"] + p["bv"]
        def split(x):
            return x.reshape(B, S, NH, DH).transpose(0, 2, 1, 3)
        qh, kh, vh = split(q), split(k), split(v)
        scores = jnp.einsum("bhqd,bhkd->bhqk", qh, kh) / math.sqrt(DH)
        bias = (1.0 - mask.astype(jnp.float32))[:, None, None, :] * -10000.0
        probs = jax.nn.softmax(scores + bias, axis=-1)
        ctx = jnp.einsum("bhqk,bhkd->bhqd", probs, vh)
        return ctx.transpose(0, 2, 1, 3).reshape(B, S, H)

    src_mask = (src_ids != 0)
    tgt_mask = (tgt_ids != 0)
    src_co = coattn(tgt_hidden, src_hidden, src_mask)   # same mask-broadcast quirk as the module
    tgt_co = coattn(src_hidden, tgt_hidden, tgt_mask)
    s_cls, t_cls = src_co[:, 0, :], tgt_co[:, 0, :]
    feat = jnp.concatenate([s_cls, t_cls, jnp.abs(s_cls - t_cls)], axis=-1)

    h = feat @ p["w1"] + p["b1"]
    h = (h - p["bn1_mean"]) * jax.lax.rsqrt(p["bn1_var"] + BN_EPS) * p["bn1_gamma"] + p["bn1_beta"]
    h = jnp.maximum(h, 0.0)
    h = h @ p["w2"] + p["b2"]
    h = (h - p["bn2_mean"]) * jax.lax.rsqrt(p["bn2_var"] + BN_EPS) * p["bn2_gamma"] + p["bn2_beta"]
    h = jnp.maximum(h, 0.0)
    logits = h @ p["w3"] + p["b3"]           # multi-sample dropout: identity in eval
    return logits, jax.nn.softmax(logits, axis=-1)


def make_params(key):
    ks = jax.random.split(key, 22)
    s = 0.05
    return {
        "word_emb": s * jax.random.normal(ks[0], (VOCAB, H), jnp.float32),
        "pos_emb": s * jax.random.normal(ks[1], (S, H), jnp.float32),
        "wq": s * jax.random.normal(ks[2], (H, H), jnp.float32),
        "bq": s * jax.random.normal(ks[3], (1, H), jnp.float32),
        "wk": s * jax.random.normal(ks[4], (H, H), jnp.float32),
        "bk": s * jax.random.normal(ks[5], (1, H), jnp.float32),
        "wv": s * jax.random.normal(ks[6], (H, H), jnp.float32),
        "bv": s * jax.random.normal(ks[7], (1, H), jnp.float32),
        "w1": s * jax.random.normal(ks[8], (3 * H, H), jnp.float32),
        "b1": s * jax.random.normal(ks[9], (1, H), jnp.float32),
        "bn1_gamma": 1.0 + 0.1 * jax.random.normal(ks[10], (1, H), jnp.float32),
        "bn1_beta": 0.1 * jax.random.normal(ks[11], (1, H), jnp.float32),
        "bn1_mean": 0.1 * jax.random.normal(ks[12], (1, H), jnp.float32),
        "bn1_var": 1.0 + 0.1 * jax.random.uniform(ks[13], (1, H), jnp.float32),
        "w2": s * jax.random.normal(ks[14], (H, MID), jnp.float32),
        "b2": s * jax.random.normal(ks[15], (1, MID), jnp.float32),
        "bn2_gamma": 1.0 + 0.1 * jax.random.normal(ks[16], (1, MID), jnp.float32),
        "bn2_beta": 0.1 * jax.random.normal(ks[17], (1, MID), jnp.float32),
        "bn2_mean": 0.1 * jax.random.normal(ks[18], (1, MID), jnp.float32),
        "bn2_var": 1.0 + 0.1 * jax.random.uniform(ks[19], (1, MID), jnp.float32),
        "w3": s * jax.random.normal(ks[20], (MID, NCLS), jnp.float32),
        "b3": s * jax.random.normal(ks[21], (1, NCLS), jnp.float32),
    }


if __name__ == "__main__":
    key = jax.random.PRNGKey(0)
    pkey, k1, k2 = jax.random.split(key, 3)
    params = make_params(pkey)

    src_ids = jax.random.randint(k1, (B, S), minval=1, maxval=VOCAB, dtype=jnp.int32)
    tgt_ids = jax.random.randint(k2, (B, S), minval=1, maxval=VOCAB, dtype=jnp.int32)
    # introduce padding (id == 0) so the attention-mask path is exercised
    src_ids = src_ids.at[:, S - 3:].set(0)
    tgt_ids = tgt_ids.at[0, S - 5:].set(0)

    # TODO(synk): the real forward runs each input through a full pretrained
    # BERT encoder; that transformer stack has no compact Pallas equivalent
    # here, so BERT outputs are approximated with deterministic word + position
    # embedding lookups (same inputs are fed to kernel and reference).
    src_hidden = params["word_emb"][src_ids] + params["pos_emb"][None, :, :]
    tgt_hidden = params["word_emb"][tgt_ids] + params["pos_emb"][None, :, :]

    logits, probs = sbert_coattn_forward(src_hidden, tgt_hidden, src_ids, tgt_ids, params)
    jax.block_until_ready((logits, probs))

    ref_logits, ref_probs = reference_forward(src_hidden, tgt_hidden, src_ids, tgt_ids, params)
    assert logits.shape == (B, NCLS) and probs.shape == (B, NCLS)
    assert jnp.allclose(logits, ref_logits, atol=2e-2, rtol=2e-2)
    assert jnp.allclose(probs, ref_probs, atol=2e-2, rtol=2e-2)

    print("KERNEL_OK")
</pallas_src>

<mosaic_0001>
module attributes {stable_mosaic.version = 11 : i64} {
  func.func @_coattn_mdp_kernel(%arg0: memref<4x128xbf16, #tpu.memory_space<vmem>>, %arg1: memref<64x128xbf16, #tpu.memory_space<vmem>>, %arg2: memref<4x16xf32, #tpu.memory_space<vmem>>, %arg3: memref<128x128xbf16, #tpu.memory_space<vmem>>, %arg4: memref<1x128xf32, #tpu.memory_space<vmem>>, %arg5: memref<128x256xbf16, #tpu.memory_space<vmem>>, %arg6: memref<1x256xf32, #tpu.memory_space<vmem>>, %arg7: memref<384x128xbf16, #tpu.memory_space<vmem>>, %arg8: memref<1x128xf32, #tpu.memory_space<vmem>>, %arg9: memref<128x128xbf16, #tpu.memory_space<vmem>>, %arg10: memref<1x128xf32, #tpu.memory_space<vmem>>, %arg11: memref<128x128xbf16, #tpu.memory_space<vmem>>, %arg12: memref<1x128xf32, #tpu.memory_space<vmem>>, %arg13: memref<2x128xf32, #tpu.memory_space<vmem>>) attributes {dimension_semantics = [], scalar_prefetch = 0 : i64, scratch_operands = 0 : i64, tpu.core_type = #tpu.core_type<tc>} {
    %c0 = arith.constant 0 : index
    %c0_0 = arith.constant 0 : index
    %0 = vector.load %arg0[%c0, %c0_0] : memref<4x128xbf16, #tpu.memory_space<vmem>>, vector<4x128xbf16>
    %c0_1 = arith.constant 0 : index
    %c0_2 = arith.constant 0 : index
    %1 = vector.load %arg3[%c0_1, %c0_2] : memref<128x128xbf16, #tpu.memory_space<vmem>>, vector<128x128xbf16>
    %cst = arith.constant dense<0.000000e+00> : vector<4x128xf32>
    %2 = tpu.matmul %0, %1, %cst {dimension_numbers = #tpu.dot_dimension_numbers<[1], [0], [0], [1], [0, 0, 1, 1], [], []>} : vector<4x128xbf16>, vector<128x128xbf16>, vector<4x128xf32> -> vector<4x128xf32>
    %c0_3 = arith.constant 0 : index
    %c0_4 = arith.constant 0 : index
    %3 = vector.load %arg4[%c0_3, %c0_4] : memref<1x128xf32, #tpu.memory_space<vmem>>, vector<1x128xf32>
    %4 = vector.broadcast %3 : vector<1x128xf32> to vector<4x128xf32>
    %5 = arith.addf %2, %4 : vector<4x128xf32>
    %c0_5 = arith.constant 0 : index
    %c0_6 = arith.constant 0 : index
    %6 = vector.load %arg1[%c0_5, %c0_6] : memref<64x128xbf16, #tpu.memory_space<vmem>>, vector<64x128xbf16>
    %c0_7 = arith.constant 0 : index
    %c0_8 = arith.constant 0 : index
    %7 = vector.load %arg5[%c0_7, %c0_8] : memref<128x256xbf16, #tpu.memory_space<vmem>>, vector<128x256xbf16>
    %cst_9 = arith.constant dense<0.000000e+00> : vector<64x256xf32>
    %8 = tpu.matmul %6, %7, %cst_9 {dimension_numbers = #tpu.dot_dimension_numbers<[1], [0], [0], [1], [0, 0, 1, 1], [], []>} : vector<64x128xbf16>, vector<128x256xbf16>, vector<64x256xf32> -> vector<64x256xf32>
    %c0_10 = arith.constant 0 : index
    %c0_11 = arith.constant 0 : index
    %9 = vector.load %arg6[%c0_10, %c0_11] : memref<1x256xf32, #tpu.memory_space<vmem>>, vector<1x256xf32>
    %10 = vector.broadcast %9 : vector<1x256xf32> to vector<64x256xf32>
    %11 = arith.addf %8, %10 : vector<64x256xf32>
    %12 = vector.extract_strided_slice %11 {offsets = [0, 0], sizes = [64, 128], strides = [1, 1]} : vector<64x256xf32> to vector<64x128xf32>
    %13 = vector.shape_cast %12 : vector<64x128xf32> to vector<4x16x128xf32>
    %14 = vector.extract_strided_slice %11 {offsets = [0, 128], sizes = [64, 128], strides = [1, 1]} : vector<64x256xf32> to vector<64x128xf32>
    %15 = vector.shape_cast %14 : vector<64x128xf32> to vector<4x16x128xf32>
    %c0_12 = arith.constant 0 : index
    %c0_13 = arith.constant 0 : index
    %16 = vector.load %arg2[%c0_12, %c0_13] : memref<4x16xf32, #tpu.memory_space<vmem>>, vector<4x16xf32>
    %17 = vector.shape_cast %5 : vector<4x128xf32> to vector<4x1x128xf32>
    %18 = vector.broadcast %17 : vector<4x1x128xf32> to vector<4x16x128xf32>
    %19 = arith.mulf %18, %13 : vector<4x16x128xf32>
    %20 = vector.extract_strided_slice %19 {offsets = [0, 0, 0], sizes = [4, 16, 64], strides = [1, 1, 1]} : vector<4x16x128xf32> to vector<4x16x64xf32>
    %cst_14 = arith.constant dense<0.000000e+00> : vector<4x16xf32>
    %21 = vector.multi_reduction <add>, %20, %cst_14 [2] : vector<4x16x64xf32> to vector<4x16xf32>
    %cst_15 = arith.constant 1.250000e-01 : f32
    %22 = vector.broadcast %cst_15 : f32 to vector<4x16xf32>
    %23 = arith.mulf %21, %22 : vector<4x16xf32>
    %24 = arith.addf %23, %16 : vector<4x16xf32>
    %cst_16 = arith.constant dense<0xFF800000> : vector<4xf32>
    %25 = vector.multi_reduction <maximumf>, %24, %cst_16 [1] : vector<4x16xf32> to vector<4xf32>
    %26 = vector.shape_cast %25 : vector<4xf32> to vector<4x1xf32>
    %27 = vector.broadcast %26 : vector<4x1xf32> to vector<4x16xf32>
    %28 = arith.subf %24, %27 : vector<4x16xf32>
    %29 = math.exp %28 : vector<4x16xf32>
    %cst_17 = arith.constant dense<0.000000e+00> : vector<4xf32>
    %30 = vector.multi_reduction <add>, %29, %cst_17 [1] : vector<4x16xf32> to vector<4xf32>
    %31 = vector.shape_cast %30 : vector<4xf32> to vector<4x1xf32>
    %32 = tpu.reciprocal %31 {approx = true} : vector<4x1xf32> -> vector<4x1xf32>
    %33 = vector.broadcast %32 : vector<4x1xf32> to vector<4x16xf32>
    %34 = arith.mulf %29, %33 : vector<4x16xf32>
    %35 = vector.shape_cast %34 : vector<4x16xf32> to vector<4x16x1xf32>
    %36 = vector.extract_strided_slice %15 {offsets = [0, 0, 0], sizes = [4, 16, 64], strides = [1, 1, 1]} : vector<4x16x128xf32> to vector<4x16x64xf32>
    %37 = vector.broadcast %35 : vector<4x16x1xf32> to vector<4x16x64xf32>
    %38 = arith.mulf %37, %36 : vector<4x16x64xf32>
    %cst_18 = arith.constant dense<0.000000e+00> : vector<4x64xf32>
    %39 = vector.multi_reduction <add>, %38, %cst_18 [1] : vector<4x16x64xf32> to vector<4x64xf32>
    %40 = vector.extract_strided_slice %19 {offsets = [0, 0, 64], sizes = [4, 16, 64], strides = [1, 1, 1]} : vector<4x16x128xf32> to vector<4x16x64xf32>
    %cst_19 = arith.constant dense<0.000000e+00> : vector<4x16xf32>
    %41 = vector.multi_reduction <add>, %40, %cst_19 [2] : vector<4x16x64xf32> to vector<4x16xf32>
    %cst_20 = arith.constant 1.250000e-01 : f32
    %42 = vector.broadcast %cst_20 : f32 to vector<4x16xf32>
    %43 = arith.mulf %41, %42 : vector<4x16xf32>
    %44 = arith.addf %43, %16 : vector<4x16xf32>
    %cst_21 = arith.constant dense<0xFF800000> : vector<4xf32>
    %45 = vector.multi_reduction <maximumf>, %44, %cst_21 [1] : vector<4x16xf32> to vector<4xf32>
    %46 = vector.shape_cast %45 : vector<4xf32> to vector<4x1xf32>
    %47 = vector.broadcast %46 : vector<4x1xf32> to vector<4x16xf32>
    %48 = arith.subf %44, %47 : vector<4x16xf32>
    %49 = math.exp %48 : vector<4x16xf32>
    %cst_22 = arith.constant dense<0.000000e+00> : vector<4xf32>
    %50 = vector.multi_reduction <add>, %49, %cst_22 [1] : vector<4x16xf32> to vector<4xf32>
    %51 = vector.shape_cast %50 : vector<4xf32> to vector<4x1xf32>
    %52 = tpu.reciprocal %51 {approx = true} : vector<4x1xf32> -> vector<4x1xf32>
    %53 = vector.broadcast %52 : vector<4x1xf32> to vector<4x16xf32>
    %54 = arith.mulf %49, %53 : vector<4x16xf32>
    %55 = vector.shape_cast %54 : vector<4x16xf32> to vector<4x16x1xf32>
    %56 = vector.extract_strided_slice %15 {offsets = [0, 0, 64], sizes = [4, 16, 64], strides = [1, 1, 1]} : vector<4x16x128xf32> to vector<4x16x64xf32>
    %57 = vector.broadcast %55 : vector<4x16x1xf32> to vector<4x16x64xf32>
    %58 = arith.mulf %57, %56 : vector<4x16x64xf32>
    %cst_23 = arith.constant dense<0.000000e+00> : vector<4x64xf32>
    %59 = vector.multi_reduction <add>, %58, %cst_23 [1] : vector<4x16x64xf32> to vector<4x64xf32>
    %60 = tpu.concatenate %39, %59 in 1 : vector<4x64xf32>, vector<4x64xf32> -> vector<4x128xf32>
    %61 = vector.extract_strided_slice %60 {offsets = [0, 0], sizes = [2, 128], strides = [1, 1]} : vector<4x128xf32> to vector<2x128xf32>
    %62 = vector.extract_strided_slice %60 {offsets = [2, 0], sizes = [2, 128], strides = [1, 1]} : vector<4x128xf32> to vector<2x128xf32>
    %63 = arith.subf %61, %62 : vector<2x128xf32>
    %64 = math.absf %63 : vector<2x128xf32>
    %65 = tpu.concatenate %61, %62, %64 in 1 : vector<2x128xf32>, vector<2x128xf32>, vector<2x128xf32> -> vector<2x384xf32>
    %66 = arith.truncf %65 : vector<2x384xf32> to vector<2x384xbf16>
    %c0_24 = arith.constant 0 : index
    %c0_25 = arith.constant 0 : index
    %67 = vector.load %arg7[%c0_24, %c0_25] : memref<384x128xbf16, #tpu.memory_space<vmem>>, vector<384x128xbf16>
    %cst_26 = arith.constant dense<0.000000e+00> : vector<2x128xf32>
    %68 = tpu.matmul %66, %67, %cst_26 {dimension_numbers = #tpu.dot_dimension_numbers<[1], [0], [0], [1], [0, 0, 1, 1], [], []>} : vector<2x384xbf16>, vector<384x128xbf16>, vector<2x128xf32> -> vector<2x128xf32>
    %c0_27 = arith.constant 0 : index
    %c0_28 = arith.constant 0 : index
    %69 = vector.load %arg8[%c0_27, %c0_28] : memref<1x128xf32, #tpu.memory_space<vmem>>, vector<1x128xf32>
    %70 = vector.broadcast %69 : vector<1x128xf32> to vector<2x128xf32>
    %71 = arith.addf %68, %70 : vector<2x128xf32>
    %cst_29 = arith.constant 0.000000e+00 : f32
    %72 = vector.broadcast %cst_29 : f32 to vector<2x128xf32>
    %73 = arith.maximumf %71, %72 : vector<2x128xf32>
    %74 = arith.truncf %73 : vector<2x128xf32> to vector<2x128xbf16>
    %c0_30 = arith.constant 0 : index
    %c0_31 = arith.constant 0 : index
    %75 = vector.load %arg9[%c0_30, %c0_31] : memref<128x128xbf16, #tpu.memory_space<vmem>>, vector<128x128xbf16>
    %cst_32 = arith.constant dense<0.000000e+00> : vector<2x128xf32>
    %76 = tpu.matmul %74, %75, %cst_32 {dimension_numbers = #tpu.dot_dimension_numbers<[1], [0], [0], [1], [0, 0, 1, 1], [], []>} : vector<2x128xbf16>, vector<128x128xbf16>, vector<2x128xf32> -> vector<2x128xf32>
    %c0_33 = arith.constant 0 : index
    %c0_34 = arith.constant 0 : index
    %77 = vector.load %arg10[%c0_33, %c0_34] : memref<1x128xf32, #tpu.memory_space<vmem>>, vector<1x128xf32>
    %78 = vector.broadcast %77 : vector<1x128xf32> to vector<2x128xf32>
    %79 = arith.addf %76, %78 : vector<2x128xf32>
    %cst_35 = arith.constant 0.000000e+00 : f32
    %80 = vector.broadcast %cst_35 : f32 to vector<2x128xf32>
    %81 = arith.maximumf %79, %80 : vector<2x128xf32>
    %82 = arith.truncf %81 : vector<2x128xf32> to vector<2x128xbf16>
    %c0_36 = arith.constant 0 : index
    %c0_37 = arith.constant 0 : index
    %83 = vector.load %arg11[%c0_36, %c0_37] : memref<128x128xbf16, #tpu.memory_space<vmem>>, vector<128x128xbf16>
    %cst_38 = arith.constant dense<0.000000e+00> : vector<2x128xf32>
    %84 = tpu.matmul %82, %83, %cst_38 {dimension_numbers = #tpu.dot_dimension_numbers<[1], [0], [0], [1], [0, 0, 1, 1], [], []>} : vector<2x128xbf16>, vector<128x128xbf16>, vector<2x128xf32> -> vector<2x128xf32>
    %c0_39 = arith.constant 0 : index
    %c0_40 = arith.constant 0 : index
    %85 = vector.load %arg12[%c0_39, %c0_40] : memref<1x128xf32, #tpu.memory_space<vmem>>, vector<1x128xf32>
    %86 = vector.broadcast %85 : vector<1x128xf32> to vector<2x128xf32>
    %87 = arith.addf %84, %86 : vector<2x128xf32>
    %c0_41 = arith.constant 0 : index
    %c0_42 = arith.constant 0 : index
    %88 = vector.load %arg13[%c0_41, %c0_42] : memref<2x128xf32, #tpu.memory_space<vmem>>, vector<2x128xf32>
    tpu.vector_store %arg13[%c0_41, %c0_42], %87 {strides = array<i32>} : memref<2x128xf32, #tpu.memory_space<vmem>>, vector<2x128xf32>,
    return
  }
}

</mosaic_0001>

<bundles_post_ra>
// kernel: sbert_coattn_forward.1
= control target key start
LH: loop header
LB: loop body
LE: loop exit
PB: predicated region body
PF: predicated region fallthrough
CT: control target
= control target key end

     0   :  { %v2081_v0 = vmov 0.0   ;;  %vm2082_vm0 = vmmov 0   ;;  %v2083_v3 = vmov 0   ;;  %v183_v13 = vlaneseq  ;;  %s2764_s3 = inlined_call_operand.vmem [shape: bf16[128,128], index: 3, kind: input, shape index: {}]   ;;  %s2765_s5 = inlined_call_operand.vmem [shape: bf16[128,256], index: 5, kind: input, shape index: {}]   ;;  %s2766_s1 = inlined_call_operand.vmem [shape: bf16[64,128], index: 1, kind: input, shape index: {}]   ;;  %s2767_s2 = inlined_call_operand.vmem [shape: f32[4,16], index: 2, kind: input, shape index: {}]   ;;  %s2768_s0 = inlined_call_operand.vmem [shape: bf16[4,128], index: 0, kind: input, shape index: {}]   ;;  %s2769_s6 = inlined_call_operand.vmem [shape: f32[1,256], index: 6, kind: input, shape index: {}]   ;;  %s2770_s4 = inlined_call_operand.vmem [shape: f32[1,128], index: 4, kind: input, shape index: {}]   ;;  %s2771_s7 = inlined_call_operand.vmem [shape: bf16[384,128], index: 7, kind: input, shape index: {}]   ;;  %s2772_s9 = inlined_call_operand.vmem [shape: bf16[128,128], index: 9, kind: input, shape index: {}]   ;;  %s2773_s11 = inlined_call_operand.vmem [shape: bf16[128,128], index: 11, kind: input, shape index: {}]   ;;  %s2774_s8 = inlined_call_operand.vmem [shape: f32[1,128], index: 8, kind: input, shape index: {}]   ;;  %s2775_s10 = inlined_call_operand.vmem [shape: f32[1,128], index: 10, kind: input, shape index: {}]   ;;  %s2776_s12 = inlined_call_operand.vmem [shape: f32[1,128], index: 12, kind: input, shape index: {}]   ;;  %s2777_s13 = inlined_call_operand.vmem [shape: f32[2,128], index: 13, kind: output, shape index: {}]  }
   0x1   :  { %1882 = vmatprep.subr.bf16.mxu0 %v2081_v0  ;;  %v1969_v1 = vld [vmem:[%s2764_s3] sm:$0xff]   ;;  %1898 = vmatprep.mubr.msk.bf16.mxu0 %vm2082_vm0, %v2081_v0  ;;  %v1973_v5 = vld [vmem:[%s2764_s3 + $0x8] sm:$0xff]   ;;  %v1974_v6 = vld [vmem:[%s2765_s5 + $0x14] ss:$8 sps:$4 sm:$0xff]   ;;  %v2084_v36 = vmov 1966171168  }
   0x2   :  { %v1970_v2 = vld [vmem:[%s2765_s5 + $0x4] ss:$8 sps:$4 sm:$0xff]   ;;  %329 = vmatprep.mubr.bf16.mxu1 %v2083_v3  ;;  %1968 = vset.pattern.permute.xlu1 %v2083_v3  ;;  %v1972_v4 = vld [vmem:[%s2765_s5] ss:$8 sps:$4 sm:$0xff]   ;;  %v1976_v7 = vld [vmem:[%s2765_s5 + $0x10] ss:$8 sps:$4 sm:$0xff]   ;;  %v373_v37 = vunpack.c.l.s4 %v2084_v36 }
   0x3   :  { %1883 = vmatpush3.bf16.msra.mxu0 %v1969_v1  ;;  %1967 = vset.pattern.permute.xlu0 %v2083_v3  ;;  %v1977_v8 = vld [vmem:[%s2764_s3 + $0x10] sm:$0xff]   ;;  %v1978_v9 = vld [vmem:[%s2765_s5 + $0x24] ss:$8 sps:$4 sm:$0xff]   ;;  %v1980_v10 = vld [vmem:[%s2765_s5 + $0x20] ss:$8 sps:$4 sm:$0xff]   ;;  %v2209_v17 = vshrl.u32 %v183_v13, 7 }
   0x4   :  { %297 = vmatprep.subr.bf16.mxu1 %v1970_v2  ;;  %1884 = vmatprep.subr.bf16.mxu0 %v2081_v0  ;;  %v1982_v11 = vld [vmem:[%s2765_s5 + $0x34] ss:$8 sps:$4 sm:$0xff]   ;;  %v1984_v14 = vld [vmem:[%s2765_s5 + $0x30] ss:$8 sps:$4 sm:$0xff]   ;;  %v1986_v15 = vld [vmem:[%s2765_s5 + $0x44] ss:$8 sps:$4 sm:$0xff]   ;;  %v374_v38 = vunpack.c.0.s8 %v373_v37 }
   0x5   :  { %298 = vmatpush1.bf16.msra.mxu1 %v1972_v4  ;;  %v1981_v12 = vld [vmem:[%s2764_s3 + $0x18] sm:$0xff]   ;;  %v1985_v16 = vld [vmem:[%s2764_s3 + $0x20] sm:$0xff]   ;;  %v1989_v20 = vld [vmem:[%s2764_s3 + $0x28] sm:$0xff]   ;;  %v2222_v21 = vsub.s32 0, %v2209_v17  ;;  %v2279_v39 = vsub.s32 1, %v2209_v17  ;;  %vm424_vm1 = vcmask 523264  }
   0x6   :  { %299 = vmatprep.subr.bf16.mxu1 %v1974_v6  ;;  %v1988_v18 = vld [vmem:[%s2765_s5 + $0x40] ss:$8 sps:$4 sm:$0xff]   ;;  %v1990_v19 = vld [vmem:[%s2765_s5 + $0x54] ss:$8 sps:$4 sm:$0xff]   ;;  %v1992_v22 = vld [vmem:[%s2765_s5 + $0x50] ss:$8 sps:$4 sm:$0xff]   ;;  %v377_v42 = vsub.s32 %v374_v38, %v2209_v17 }
   0x7   :  { %1885 = vmatpush3.bf16.msra.mxu0 %v1973_v5  ;;  %v1994_v23 = vld [vmem:[%s2765_s5 + $0x64] ss:$8 sps:$4 sm:$0xff]   ;;  %v1993_v24 = vld [vmem:[%s2764_s3 + $0x30] sm:$0xff]   ;;  %v2237_v25 = vld [vmem:[%s2767_s2] sm:$0xf]  ;;  %vm561_vm2 = vcmask 130112  }
   0x8   :  { %1886 = vmatprep.subr.bf16.mxu0 %v2081_v0  ;;  %v1996_v26 = vld [vmem:[%s2765_s5 + $0x60] ss:$8 sps:$4 sm:$0xff]   ;;  %v2244_v27 = vrot.slane %v2237_v25, %v2222_v21  ;;  %v1998_v28 = vld [vmem:[%s2765_s5 + $0x74] ss:$8 sps:$4 sm:$0xff]   ;;  %v2000_v30 = vld [vmem:[%s2765_s5 + $0x70] ss:$8 sps:$4 sm:$0xff]  }
   0x9   :  { %300 = vmatpush1.bf16.msra.mxu1 %v1976_v7  ;;  %v1997_v29 = vld [vmem:[%s2764_s3 + $0x38] sm:$0xff]   ;;  %v45_v31 = vld [vmem:[%s2768_s0] sm:$0x3]  ;;  %v2002_v33 = vld [vmem:[%s2766_s1 + $0x8] sm:$0xff]   ;;  %vm590_vm3 = vcmask 1041409   ;;  %vm592_vm4 = vcmask 1042434  }
   0xa   :  { %301 = vmatprep.subr.bf16.mxu1 %v1978_v9  ;;  %463 = vbcast.lane.b32.xlu1 %v2244_v27, 256  ;;  %v2001_v32 = vld [vmem:[%s2766_s1] sm:$0xff]   ;;  %v2003_v34 = vld [vmem:[%s2766_s1 + $0x10] sm:$0xff]   ;;  %v2004_v35 = vld [vmem:[%s2766_s1 + $0x18] sm:$0xff]   ;;  %s2085_s1 = smov 64   ;;  %vm594_vm5 = vcmask 1043459  }
   0xb   :  { %1887 = vmatpush3.bf16.msra.mxu0 %v1977_v8  ;;  %v181_v40 = vld [vmem:[%s2769_s6] sm:$0x3]  ;;  %vm597_vm6 = vcmask 125952   ;;  %vm1180_vm7 = vcmask 1048064  }
   0xc   :  { %1888 = vmatprep.subr.bf16.mxu0 %v2081_v0  ;;  %v1752_v41 = vld [vmem:[%s2770_s4] ss:$0 sm:$0xff]  ;;  %v190_v44 = vrot.slane %v181_v40, %v2279_v39  ;;  %v186_v50 = vrot.slane %v181_v40, %v2222_v21 }
   0xd   :  { %302 = vmatpush1.bf16.msra.mxu1 %v1980_v10 }
   0xe   :  { %303 = vmatprep.subr.bf16.mxu1 %v1982_v11 }
   0xf   :  { %1889 = vmatpush3.bf16.msra.mxu0 %v1981_v12 }
  0x10   :  { %1890 = vmatprep.subr.bf16.mxu0 %v2081_v0 }
  0x11   :  { %304 = vmatpush1.bf16.msra.mxu1 %v1984_v14 }
  0x12   :  { %305 = vmatprep.subr.bf16.mxu1 %v1986_v15 }
  0x13   :  { %1891 = vmatpush3.bf16.msra.mxu0 %v1985_v16 }
  0x14   :  { %1892 = vmatprep.subr.bf16.mxu0 %v2081_v0 }
  0x15   :  { %306 = vmatpush1.bf16.msra.mxu1 %v1988_v18 }
  0x16   :  { %307 = vmatprep.subr.bf16.mxu1 %v1990_v19 }
  0x17   :  { %1893 = vmatpush3.bf16.msra.mxu0 %v1989_v20 }
  0x18   :  { %1894 = vmatprep.subr.bf16.mxu0 %v2081_v0 }
  0x19   :  { %308 = vmatpush1.bf16.msra.mxu1 %v1992_v22 }
  0x1a   :  { %309 = vmatprep.subr.bf16.mxu1 %v1994_v23 }
  0x1b   :  { %1895 = vmatpush3.bf16.msra.mxu0 %v1993_v24 }
  0x1c   :  { %1896 = vmatprep.subr.bf16.mxu0 %v2081_v0 }
  0x1d   :  { %310 = vmatpush1.bf16.msra.mxu1 %v1996_v26 }
  0x1e   :  { %311 = vmatprep.subr.bf16.mxu1 %v1998_v28 }
  0x1f   :  { %1897 = vmatpush3.bf16.msra.mxu0 %v1997_v29 }
  0x21   :  { %312 = vmatpush1.bf16.msra.mxu1 %v2000_v30 }
  0x22   :  { %1899 = vmatmul.mubr.bf16.vlgmr.msra.gmra.mrb[0].mxu0 %v45_v31  ;;  %1902 = vmatprep.subr.bf16.mxu1 %v2081_v0 }
  0x24   :  { %330 = vmatmul.mubr.bf16.vlgmr.msra.gmra.mrb[0].mxu1 %v2001_v32 }
  0x25   :  { %339 = vmatprep.mubr.bf16.mxu1 %v2083_v3 }
  0x2c   :  { %340 = vmatmul.mubr.bf16.gmra.mrb[4].mxu1 %v2002_v33 }
  0x2d   :  { %349 = vmatprep.mubr.bf16.mxu1 %v2083_v3 }
  0x34   :  { %350 = vmatmul.mubr.bf16.gmra.mrb[8].mxu1 %v2003_v34 }
  0x35   :  { %359 = vmatprep.mubr.bf16.mxu1 %v2083_v3 }
  0x3c   :  { %360 = vmatmul.mubr.bf16.gmra.mrb[12].mxu1 %v2004_v35 }
  0x3d   :  { %1918 = vmatprep.mubr.msk.bf16.mxu1 %vm2082_vm0, %v2081_v0 }
  0xf5   :  { %v151_v43 = vpop.f32.mrb[0].mxu0 }
  0xf6   :  { %v152_v45 = vadd.f32 %v1752_v41, %v151_v43  ;;  %v1900_v46 = vpop.f32.mrb[1].mxu0 }
  0xf7   :  { %v331_v47 = vpop.f32.mrb[0].mxu1  ;;  %v154_v48 = vpop.f32.mrb[2].mxu0 }
  0xf8   :  { %v378_v49 = vrot.slane %v152_v45, %v377_v42  ;;  %v333_v51 = vpop.f32.mrb[1].mxu1  ;;  %v1901_v52 = vpop.f32.mrb[3].mxu0  ;;  %v332_v59 = vadd.f32 %v331_v47, %v186_v50 }
  0xf9   :  { %v2290_v53 = vadd.f32 %v333_v51, %v190_v44  ;;  %v335_v54 = vpop.f32.mrb[2].mxu1  ;;  %v472_v52 = vrot.slane %v2237_v25, %v2279_v39 }
  0xfa   :  { %v379_v55 = vcombine.high %v378_v49, %v378_v49  ;;  %v386_v56 = vrot.slane %v378_v49, %v377_v42  ;;  %v337_v57 = vpop.f32.mrb[3].mxu1  ;;  %v336_v60 = vadd.f32 %v335_v54, %v186_v50  ;;  %v2333_v54 = vpop.permute.xlu1 %463 }
  0xfb   :  { %v2292_v58 = vadd.f32 %v337_v57, %v190_v44 }
  0xfc   :  { %v393_v61 = vrot.slane %v379_v55, %v377_v42  ;;  %v399_v62 = vrot.slane %v386_v56, %v2222_v21  ;;  %v394_v15 = vcombine.high %v386_v56, %v386_v56 }
  0xfe   :  { %v403_v63 = vrot.slane %v393_v61, %v2222_v21  ;;  %v416_v1 = vmul.f32 %v399_v62, %v332_v59  ;;  %v417_v2 = vmul.f32 %v399_v62, %v336_v60  ;;  %v407_v20 = vrot.slane %v394_v15, %v2222_v21 }
  0xff   :  { %v341_v3 = vpop.f32.mrb[4].mxu1  ;;  %v395_v31 = vcombine.high %v393_v61, %v393_v61 }
 0x100   :  { %v342_v4 = vadd.f32 %v341_v3, %v186_v50  ;;  %v343_v5 = vpop.f32.mrb[5].mxu1  ;;  %843 = vrot.lane.b32.xlu0 %v416_v1, %s2085_s1  ;;  %v428_v6 = vsel %vm424_vm1, %v417_v2, 0.0  ;;  %v425_v45 = vsel %vm424_vm1, %v416_v1, 0.0 }
 0x101   :  { %v2298_v7 = vadd.f32 %v343_v5, %v190_v44  ;;  %v345_v8 = vpop.f32.mrb[6].mxu1  ;;  %429 = vadd.xlane.f32.xlu1 %v428_v6  ;;  %v411_v35 = vrot.slane %v395_v31, %v2222_v21 }
 0x102   :  { %v418_v9 = vmul.f32 %v403_v63, %v342_v4  ;;  %v346_v10 = vadd.f32 %v345_v8, %v186_v50  ;;  %v347_v11 = vpop.f32.mrb[7].mxu1 }
 0x103   :  { %v2300_v12 = vadd.f32 %v347_v11, %v190_v44 }
 0x104   :  { %v419_v14 = vmul.f32 %v403_v63, %v346_v10  ;;  %845 = vrot.lane.b32.xlu0 %v417_v2, %s2085_s1  ;;  %v431_v46 = vsel %vm424_vm1, %v418_v9, 0.0 }
 0x106   :  { %v434_v47 = vsel %vm424_vm1, %v419_v14, 0.0 }
 0x107   :  { %v351_v16 = vpop.f32.mrb[8].mxu1 }
 0x108   :  { %v352_v18 = vadd.f32 %v351_v16, %v186_v50  ;;  %v353_v19 = vpop.f32.mrb[9].mxu1 }
 0x109   :  { %v2304_v22 = vadd.f32 %v353_v19, %v190_v44  ;;  %v355_v23 = vpop.f32.mrb[10].mxu1 }
 0x10a   :  { %v356_v24 = vadd.f32 %v355_v23, %v186_v50  ;;  %v357_v26 = vpop.f32.mrb[11].mxu1  ;;  %v420_v28 = vmul.f32 %v407_v20, %v352_v18  ;;  %v2344_v18 = vsub.s32 3, %v2209_v17 }
 0x10b   :  { %v2306_v29 = vadd.f32 %v357_v26, %v190_v44 }
 0x10c   :  { %v421_v30 = vmul.f32 %v407_v20, %v356_v24  ;;  %v437_v48 = vsel %vm424_vm1, %v420_v28, 0.0  ;;  %v494_v20 = vrot.slane %v2237_v25, %v2344_v18 }
 0x10f   :  { %v361_v32 = vpop.f32.mrb[12].mxu1 }
 0x110   :  { %v362_v33 = vadd.f32 %v361_v32, %v186_v50  ;;  %v363_v34 = vpop.f32.mrb[13].mxu1 }
 0x111   :  { %v2309_v36 = vadd.f32 %v363_v34, %v190_v44  ;;  %v365_v37 = vpop.f32.mrb[14].mxu1 }
 0x112   :  { %v366_v38 = vadd.f32 %v365_v37, %v186_v50  ;;  %847 = vrot.lane.b32.xlu1 %v418_v9, %s2085_s1  ;;  %v367_v40 = vpop.f32.mrb[15].mxu1  ;;  %v422_v41 = vmul.f32 %v411_v35, %v362_v33  ;;  %v2325_v50 = vsub.s32 2, %v2209_v17 }
 0x113   :  { %v2312_v42 = vadd.f32 %v367_v40, %v190_v44  ;;  %v440_v44 = vsel %vm424_vm1, %v421_v30, 0.0 }
 0x114   :  { %v423_v43 = vmul.f32 %v411_v35, %v366_v38  ;;  %v443_v49 = vsel %vm424_vm1, %v422_v41, 0.0  ;;  %v483_v51 = vrot.slane %v2237_v25, %v2325_v50 }
 0x116   :  { %849 = vrot.lane.b32.xlu1 %v419_v14, %s2085_s1  ;;  %v446_v59 = vsel %vm424_vm1, %v423_v43, 0.0 }
 0x123   :  { %426 = vadd.xlane.f32.xlu0 %v425_v45 }
 0x127   :  { %432 = vadd.xlane.f32.xlu0 %v431_v46 }
 0x12b   :  { %435 = vadd.xlane.f32.xlu0 %v434_v47 }
 0x13a   :  { %438 = vadd.xlane.f32.xlu1 %v437_v48 }
 0x141   :  { %851 = vrot.lane.b32.xlu0 %v420_v28, %s2085_s1 }
 0x14b   :  { %853 = vrot.lane.b32.xlu1 %v421_v30, %s2085_s1 }
 0x160   :  { %441 = vadd.xlane.f32.xlu0 %v440_v44 }
 0x16f   :  { %444 = vadd.xlane.f32.xlu1 %v443_v49 }
 0x172   :  { %v844_v56 = vpop.permute.xlu0 %843 }
 0x173   :  { %v867_v63 = vsel %vm424_vm1, %v844_v56, 0.0 }
 0x176   :  { %855 = vrot.lane.b32.xlu0 %v422_v41, %s2085_s1 }
 0x17a   :  { %467 = vbcast.lane.b32.xlu0 %v2244_v27, 264  ;;  %v846_v27 = vpop.permute.xlu0 %845 }
 0x17b   :  { %v870_v60 = vsel %vm424_vm1, %v846_v27, 0.0 }
 0x17e   :  { %485 = vbcast.lane.b32.xlu0 %v483_v51, 256 }
 0x180   :  { %857 = vrot.lane.b32.xlu1 %v423_v43, %s2085_s1 }
 0x184   :  { %474 = vbcast.lane.b32.xlu1 %v472_v52, 256 }
 0x188   :  { %478 = vbcast.lane.b32.xlu1 %v472_v52, 264 }
 0x18c   :  { %489 = vbcast.lane.b32.xlu1 %v483_v51, 264 }
 0x18e   :  { %v430_v55 = vpop.xlane.xlu1 %429 }
 0x18f   :  { %v450_v26 = vmul.f32 0.125, %v430_v55 }
 0x192   :  { %v848_v57 = vpop.permute.xlu1 %847 }
 0x193   :  { %v873_v2 = vsel %vm424_vm1, %v848_v57, 0.0 }
 0x196   :  { %v850_v61 = vpop.permute.xlu1 %849 }
 0x197   :  { %v876_v62 = vsel %vm424_vm1, %v850_v61, 0.0 }
 0x19d   :  { %447 = vadd.xlane.f32.xlu0 %v446_v59 }
 0x1a1   :  { %871 = vadd.xlane.f32.xlu0 %v870_v60 }
 0x1a5   :  { %877 = vadd.xlane.f32.xlu0 %v876_v62 }
 0x1b0   :  { %v427_v1 = vpop.xlane.xlu0 %426  ;;  %868 = vadd.xlane.f32.xlu1 %v867_v63 }
 0x1b1   :  { %v449_v25 = vmul.f32 0.125, %v427_v1 }
 0x1b3   :  { %v2359_v38 = vadd.f32 %v2333_v54, %v449_v25 }
 0x1b4   :  { %v433_v3 = vpop.xlane.xlu0 %432  ;;  %874 = vadd.xlane.f32.xlu1 %v873_v2 }
 0x1b5   :  { %v451_v31 = vmul.f32 0.125, %v433_v3 }
 0x1b8   :  { %v436_v4 = vpop.xlane.xlu0 %435 }
 0x1b9   :  { %v452_v40 = vmul.f32 0.125, %v436_v4 }
 0x1bc   :  { %v852_v5 = vpop.permute.xlu0 %851 }
 0x1bd   :  { %v879_v6 = vsel %vm424_vm1, %v852_v5, 0.0 }
 0x1be   :  { %880 = vadd.xlane.f32.xlu1 %v879_v6 }
 0x1c7   :  { %v439_v8 = vpop.xlane.xlu1 %438 }
 0x1c8   :  { %v453_v34 = vmul.f32 0.125, %v439_v8 }
 0x1cb   :  { %v854_v9 = vpop.permute.xlu1 %853 }
 0x1cc   :  { %v882_v10 = vsel %vm424_vm1, %v854_v9, 0.0 }
 0x1cd   :  { %883 = vadd.xlane.f32.xlu0 %v882_v10 }
 0x1ed   :  { %v442_v11 = vpop.xlane.xlu0 %441 }
 0x1ee   :  { %v454_v45 = vmul.f32 0.125, %v442_v11 }
 0x1f1   :  { %v856_v14 = vpop.permute.xlu0 %855 }
 0x1f2   :  { %v885_v15 = vsel %vm424_vm1, %v856_v14, 0.0 }
 0x1f3   :  { %886 = vadd.xlane.f32.xlu1 %v885_v15 }
 0x1f5   :  { %v468_v24 = vpop.permute.xlu0 %467 }
 0x1f6   :  { %v2349_v28 = vadd.f32 %v468_v24, %v450_v26 }
 0x1f9   :  { %v486_v33 = vpop.permute.xlu0 %485 }
 0x1fa   :  { %v2355_v35 = vadd.f32 %v486_v33, %v453_v34 }
 0x1fc   :  { %v445_v16 = vpop.xlane.xlu1 %444 }
 0x1fd   :  { %v455_v5 = vmul.f32 0.125, %v445_v16 }
 0x200   :  { %v858_v19 = vpop.permute.xlu1 %857 }
 0x201   :  { %v888_v23 = vsel %vm424_vm1, %v858_v19, 0.0 }
 0x202   :  { %889 = vadd.xlane.f32.xlu0 %v888_v23 }
 0x204   :  { %500 = vbcast.lane.b32.xlu1 %v494_v20, 264  ;;  %v475_v30 = vpop.permute.xlu1 %474 }
 0x205   :  { %v2352_v32 = vadd.f32 %v475_v30, %v451_v31  ;;  %v551_v31 = vand.u32 127, %v183_v13 }
 0x208   :  { %530 = vperm.xlu1 %1968, %v2349_v28   ;;  %v479_v37 = vpop.permute.xlu1 %478 }
 0x209   :  { %v2362_v41 = vadd.f32 %v479_v37, %v452_v40  ;;  %v2401_v40 = vsub.s32 %v551_v31, %v2209_v17 }
 0x20c   :  { %533 = vperm.xlu1 %1968, %v2352_v32   ;;  %v490_v43 = vpop.permute.xlu1 %489 }
 0x20d   :  { %v2365_v46 = vadd.f32 %v490_v43, %v454_v45 }
 0x210   :  { %539 = vperm.xlu1 %1968, %v2355_v35  }
 0x218   :  { %496 = vbcast.lane.b32.xlu0 %v494_v20, 256 }
 0x21c   :  { %527 = vperm.xlu0 %1967, %v2359_v38  }
 0x220   :  { %536 = vperm.xlu0 %1967, %v2362_v41  }
 0x224   :  { %542 = vperm.xlu0 %1967, %v2365_v46  }
 0x22a   :  { %v448_v44 = vpop.xlane.xlu0 %447 }
 0x22b   :  { %v456_v55 = vmul.f32 0.125, %v448_v44 }
 0x22e   :  { %v872_v51 = vpop.xlane.xlu0 %871 }
 0x22f   :  { %v892_v57 = vmul.f32 0.125, %v872_v51 }
 0x231   :  { %v2371_v60 = vadd.f32 %v892_v57, %v468_v24 }
 0x232   :  { %v878_v27 = vpop.xlane.xlu0 %877 }
 0x233   :  { %v894_v61 = vmul.f32 0.125, %v878_v27 }
 0x235   :  { %v2374_v63 = vadd.f32 %v894_v61, %v479_v37 }
 0x23d   :  { %v869_v47 = vpop.xlane.xlu1 %868 }
 0x23e   :  { %v891_v8 = vmul.f32 0.125, %v869_v47 }
 0x240   :  { %v2387_v11 = vadd.f32 %v891_v8, %v2333_v54 }
 0x241   :  { %v875_v48 = vpop.xlane.xlu1 %874 }
 0x242   :  { %v893_v14 = vmul.f32 0.125, %v875_v48 }
 0x244   :  { %v2390_v15 = vadd.f32 %v893_v14, %v475_v30  ;;  %v556_v30 = vadd.s32 4294967288, %v551_v31 }
 0x24b   :  { %v881_v49 = vpop.xlane.xlu1 %880 }
 0x24c   :  { %v895_v16 = vmul.f32 0.125, %v881_v49 }
 0x24e   :  { %v2393_v19 = vadd.f32 %v895_v16, %v486_v33  ;;  %v2404_v33 = vsub.s32 %v556_v30, %v2209_v17 }
 0x25a   :  { %v884_v62 = vpop.xlane.xlu0 %883 }
 0x25b   :  { %v896_v1 = vmul.f32 0.125, %v884_v62 }
 0x25d   :  { %v2377_v3 = vadd.f32 %v896_v1, %v490_v43 }
 0x280   :  { %v887_v52 = vpop.xlane.xlu1 %886 }
 0x281   :  { %v897_v20 = vmul.f32 0.125, %v887_v52 }
 0x284   :  { %v501_v56 = vpop.permute.xlu1 %500 }
 0x285   :  { %v2368_v59 = vadd.f32 %v501_v56, %v456_v55 }
 0x287   :  { %548 = vperm.xlu0 %1967, %v2368_v59  }
 0x288   :  { %v531_v26 = vpop.permute.xlu1 %530 }
 0x289   :  { %v560_v51 = vrot.slane %v531_v26, %v2404_v33 }
 0x28b   :  { %919 = vperm.xlu0 %1967, %v2371_v60  }
 0x28c   :  { %v534_v25 = vpop.permute.xlu1 %533 }
 0x28d   :  { %v566_v44 = vrot.slane %v534_v25, %v2401_v40 }
 0x28f   :  { %v890_v2 = vpop.xlane.xlu0 %889  ;;  %925 = vperm.xlu0 %1967, %v2374_v63  }
 0x290   :  { %v898_v4 = vmul.f32 0.125, %v890_v2  ;;  %v540_v43 = vpop.permute.xlu1 %539 }
 0x291   :  { %v575_v49 = vrot.slane %v540_v43, %v2401_v40 }
 0x292   :  { %v2382_v10 = vadd.f32 %v898_v4, %v501_v56 }
 0x293   :  { %v497_v6 = vpop.permute.xlu0 %496  ;;  %931 = vperm.xlu0 %1967, %v2377_v3  }
 0x294   :  { %v2380_v9 = vadd.f32 %v497_v6, %v455_v5  ;;  %v2396_v23 = vadd.f32 %v897_v20, %v497_v6 }
 0x296   :  { %545 = vperm.xlu1 %1968, %v2380_v9  }
 0x297   :  { %937 = vperm.xlu0 %1967, %v2382_v10  }
 0x29a   :  { %916 = vperm.xlu1 %1968, %v2387_v11  }
 0x29b   :  { %v528_v24 = vpop.permute.xlu0 %527 }
 0x29c   :  { %v555_v13 = vrot.slane %v528_v24, %v2401_v40 }
 0x29e   :  { %922 = vperm.xlu1 %1968, %v2390_v15   ;;  %v562_v56 = vsel %vm561_vm2, %v560_v51, %v555_v13 }
 0x29f   :  { %v537_v54 = vpop.permute.xlu0 %536 }
 0x2a0   :  { %v570_v45 = vrot.slane %v537_v54, %v2404_v33 }
 0x2a2   :  { %928 = vperm.xlu1 %1968, %v2393_v19   ;;  %v571_v52 = vsel %vm561_vm2, %v570_v45, %v566_v44 }
 0x2a3   :  { %v543_v34 = vpop.permute.xlu0 %542  ;;  %v591_v62 = vsel %vm590_vm3, %v571_v52, %v562_v56 }
 0x2a4   :  { %v579_v47 = vrot.slane %v543_v34, %v2404_v33 }
 0x2a6   :  { %934 = vperm.xlu1 %1968, %v2396_v23   ;;  %v580_v17 = vsel %vm561_vm2, %v579_v47, %v575_v49 }
 0x2a7   :  { %v593_v2 = vsel %vm592_vm4, %v580_v17, %v591_v62 }
 0x306   :  { %v549_v37 = vpop.permute.xlu0 %548 }
 0x307   :  { %v588_v57 = vrot.slane %v549_v37, %v2404_v33 }
 0x30a   :  { %v920_v48 = vpop.permute.xlu0 %919 }
 0x30b   :  { %v946_v30 = vrot.slane %v920_v48, %v2404_v33 }
 0x30e   :  { %v926_v61 = vpop.permute.xlu0 %925 }
 0x30f   :  { %v955_v24 = vrot.slane %v926_v61, %v2404_v33 }
 0x312   :  { %v932_v8 = vpop.permute.xlu0 %931 }
 0x313   :  { %v964_v31 = vrot.slane %v932_v8, %v2404_v33 }
 0x315   :  { %v546_v55 = vpop.permute.xlu1 %545 }
 0x316   :  { %v584_v27 = vrot.slane %v546_v55, %v2401_v40  ;;  %v938_v34 = vpop.permute.xlu0 %937 }
 0x317   :  { %v973_v45 = vrot.slane %v938_v34, %v2404_v33 }
 0x318   :  { %v589_v1 = vsel %vm561_vm2, %v588_v57, %v584_v27 }
 0x319   :  { %v917_v4 = vpop.permute.xlu1 %916  ;;  %v595_v5 = vsel %vm594_vm5, %v589_v1, %v593_v2 }
 0x31a   :  { %v598_v6 = vsel %vm597_vm6, %v595_v5, -inf  ;;  %v942_v54 = vrot.slane %v917_v4, %v2401_v40 }
 0x31b   :  { %599 = vmax.xlane.f32.xlu1 %v598_v6 }
 0x31c   :  { %v947_v47 = vsel %vm561_vm2, %v946_v30, %v942_v54 }
 0x31d   :  { %v923_v14 = vpop.permute.xlu1 %922 }
 0x31e   :  { %v951_v16 = vrot.slane %v923_v14, %v2401_v40 }
 0x320   :  { %v956_v25 = vsel %vm561_vm2, %v955_v24, %v951_v16 }
 0x321   :  { %v929_v20 = vpop.permute.xlu1 %928  ;;  %v975_v13 = vsel %vm590_vm3, %v956_v25, %v947_v47 }
 0x322   :  { %v960_v26 = vrot.slane %v929_v20, %v2401_v40 }
 0x324   :  { %v965_v37 = vsel %vm561_vm2, %v964_v31, %v960_v26 }
 0x325   :  { %v935_v43 = vpop.permute.xlu1 %934  ;;  %v976_v51 = vsel %vm592_vm4, %v965_v37, %v975_v13 }
 0x326   :  { %v969_v44 = vrot.slane %v935_v43, %v2401_v40 }
 0x328   :  { %v974_v49 = vsel %vm561_vm2, %v973_v45, %v969_v44 }
 0x329   :  { %v977_v52 = vsel %vm594_vm5, %v974_v49, %v976_v51 }
 0x32a   :  { %v979_v48 = vsel %vm597_vm6, %v977_v52, -inf }
 0x32b   :  { %980 = vmax.xlane.f32.xlu0 %v979_v48 }
 0x3a8   :  { %v600_v17 = vpop.xlane.xlu1 %599 }
 0x3a9   :  { %v605_v55 = vrot.slane %v600_v17, %v2222_v21  ;;  %v609_v56 = vrot.slane %v600_v17, %v2279_v39  ;;  %v613_v57 = vrot.slane %v600_v17, %v2325_v50  ;;  %v617_v5 = vrot.slane %v600_v17, %v2344_v18 }
 0x3ab   :  { %v622_v27 = vsub.f32 %v2359_v38, %v605_v55  ;;  %v623_v61 = vsub.f32 %v2349_v28, %v605_v55  ;;  %v625_v62 = vsub.f32 %v2362_v41, %v609_v56  ;;  %v624_v1 = vsub.f32 %v2352_v32, %v609_v56 }
 0x3ac   :  { %v627_v6 = vsub.f32 %v2365_v46, %v613_v57  ;;  %v626_v14 = vsub.f32 %v2355_v35, %v613_v57  ;;  %v629_v38 = vsub.f32 %v2368_v59, %v617_v5  ;;  %v628_v41 = vsub.f32 %v2380_v9, %v617_v5 }
 0x3ad   :  { %v630_v2 = vmul.f32 1.442695, %v622_v27  ;;  %v632_v4 = vmul.f32 1.442695, %v623_v61  ;;  %v636_v8 = vmul.f32 1.442695, %v625_v62 }
 0x3ae   :  { %v634_v16 = vmul.f32 1.442695, %v624_v1  ;;  %v640_v28 = vmul.f32 1.442695, %v627_v6  ;;  %v638_v32 = vmul.f32 1.442695, %v626_v14 }
 0x3af   :  { %2045 = vpow2.f32 %v630_v2  ;;  %v644_v20 = vmul.f32 1.442695, %v629_v38  ;;  %v642_v24 = vmul.f32 1.442695, %v628_v41 }
 0x3b0   :  { %2047 = vpow2.f32 %v632_v4 }
 0x3b1   :  { %2049 = vpow2.f32 %v636_v8 }
 0x3b2   :  { %2051 = vpow2.f32 %v634_v16 }
 0x3b3   :  { %2053 = vpow2.f32 %v640_v28 }
 0x3b4   :  { %2055 = vpow2.f32 %v638_v32 }
 0x3b5   :  { %2057 = vpow2.f32 %v644_v20 }
 0x3b6   :  { %2059 = vpow2.f32 %v642_v24 }
 0x3b8   :  { %v981_v54 = vpop.xlane.xlu0 %980 }
 0x3b9   :  { %v2450_v46 = vpop.eup %2045  ;;  %v986_v26 = vrot.slane %v981_v54, %v2222_v21  ;;  %v990_v35 = vrot.slane %v981_v54, %v2279_v39  ;;  %v994_v59 = vrot.slane %v981_v54, %v2325_v50  ;;  %v998_v44 = vrot.slane %v981_v54, %v2344_v18 }
 0x3ba   :  { %v2454_v31 = vpop.eup %2047  ;;  %655 = vperm.xlu0 %1967, %v2450_v46  }
 0x3bb   :  { %v1003_v9 = vsub.f32 %v2387_v11, %v986_v26  ;;  %v1004_v34 = vsub.f32 %v2371_v60, %v986_v26  ;;  %v1005_v30 = vsub.f32 %v2390_v15, %v990_v35  ;;  %658 = vperm.xlu1 %1968, %v2454_v31   ;;  %v1006_v25 = vsub.f32 %v2374_v63, %v990_v35  ;;  %v2463_v37 = vpop.eup %2049 }
 0x3bc   :  { %v2465_v47 = vpop.eup %2051  ;;  %v1007_v11 = vsub.f32 %v2393_v19, %v994_v59  ;;  %v1008_v15 = vsub.f32 %v2377_v3, %v994_v59  ;;  %v1009_v51 = vsub.f32 %v2396_v23, %v998_v44  ;;  %v1010_v48 = vsub.f32 %v2382_v10, %v998_v44 }
 0x3bd   :  { %v1011_v43 = vmul.f32 1.442695, %v1003_v9  ;;  %v1013_v45 = vmul.f32 1.442695, %v1004_v34  ;;  %v1015_v60 = vmul.f32 1.442695, %v1005_v30  ;;  %v2472_v13 = vpop.eup %2053 }
 0x3be   :  { %664 = vperm.xlu0 %1967, %v2463_v37   ;;  %v1017_v63 = vmul.f32 1.442695, %v1006_v25  ;;  %v2474_v49 = vpop.eup %2055  ;;  %v1019_v52 = vmul.f32 1.442695, %v1007_v11  ;;  %v1021_v3 = vmul.f32 1.442695, %v1008_v15 }
 0x3bf   :  { %2061 = vpow2.f32 %v1011_v43  ;;  %661 = vperm.xlu1 %1968, %v2465_v47   ;;  %v2479_v19 = vpop.eup %2057  ;;  %v1023_v55 = vmul.f32 1.442695, %v1009_v51  ;;  %v1025_v23 = vmul.f32 1.442695, %v1010_v48 }
 0x3c0   :  { %2063 = vpow2.f32 %v1013_v45  ;;  %v2482_v17 = vpop.eup %2059 }
 0x3c1   :  { %2065 = vpow2.f32 %v1015_v60 }
 0x3c2   :  { %670 = vperm.xlu0 %1967, %v2472_v13   ;;  %2067 = vpow2.f32 %v1017_v63 }
 0x3c3   :  { %667 = vperm.xlu1 %1968, %v2474_v49   ;;  %2069 = vpow2.f32 %v1019_v52 }
 0x3c4   :  { %2071 = vpow2.f32 %v1021_v3 }
 0x3c5   :  { %2073 = vpow2.f32 %v1023_v55 }
 0x3c6   :  { %676 = vperm.xlu0 %1967, %v2479_v19   ;;  %2075 = vpow2.f32 %v1025_v23 }
 0x3c7   :  { %673 = vperm.xlu1 %1968, %v2482_v17  }
 0x3c9   :  { %v2486_v56 = vpop.eup %2061 }
 0x3ca   :  { %v2488_v57 = vpop.eup %2063 }
 0x3cb   :  { %1036 = vperm.xlu1 %1968, %v2486_v56   ;;  %1039 = vperm.xlu0 %1967, %v2488_v57   ;;  %v2492_v10 = vpop.eup %2065 }
 0x3cc   :  { %v2494_v27 = vpop.eup %2067 }
 0x3cd   :  { %v2498_v61 = vpop.eup %2069 }
 0x3ce   :  { %v2500_v62 = vpop.eup %2071 }
 0x3cf   :  { %1042 = vperm.xlu1 %1968, %v2492_v10   ;;  %1045 = vperm.xlu0 %1967, %v2494_v27   ;;  %v2504_v1 = vpop.eup %2073 }
 0x3d0   :  { %v2506_v2 = vpop.eup %2075 }
 0x3d3   :  { %1048 = vperm.xlu1 %1968, %v2498_v61   ;;  %1051 = vperm.xlu0 %1967, %v2500_v62  }
 0x3d7   :  { %1054 = vperm.xlu1 %1968, %v2504_v1   ;;  %1057 = vperm.xlu0 %1967, %v2506_v2  }
 0x439   :  { %v656_v4 = vpop.permute.xlu0 %655 }
 0x43a   :  { %v659_v5 = vpop.permute.xlu1 %658  ;;  %v681_v20 = vrot.slane %v656_v4, %v2401_v40 }
 0x43b   :  { %v685_v32 = vrot.slane %v659_v5, %v2404_v33 }
 0x43d   :  { %v665_v6 = vpop.permute.xlu0 %664  ;;  %v686_v34 = vsel %vm561_vm2, %v685_v32, %v681_v20 }
 0x43e   :  { %v662_v8 = vpop.permute.xlu1 %661  ;;  %v694_v16 = vrot.slane %v665_v6, %v2404_v33 }
 0x43f   :  { %v690_v14 = vrot.slane %v662_v8, %v2401_v40 }
 0x441   :  { %v671_v38 = vpop.permute.xlu0 %670  ;;  %v695_v54 = vsel %vm561_vm2, %v694_v16, %v690_v14 }
 0x442   :  { %v668_v28 = vpop.permute.xlu1 %667  ;;  %v703_v41 = vrot.slane %v671_v38, %v2404_v33  ;;  %v714_v25 = vsel %vm590_vm3, %v695_v54, %v686_v34 }
 0x443   :  { %v699_v24 = vrot.slane %v668_v28, %v2401_v40 }
 0x445   :  { %v677_v26 = vpop.permute.xlu0 %676  ;;  %v704_v35 = vsel %vm561_vm2, %v703_v41, %v699_v24 }
 0x446   :  { %v674_v59 = vpop.permute.xlu1 %673  ;;  %v712_v9 = vrot.slane %v677_v26, %v2404_v33  ;;  %v715_v45 = vsel %vm592_vm4, %v704_v35, %v714_v25 }
 0x447   :  { %v708_v30 = vrot.slane %v674_v59, %v2401_v40 }
 0x449   :  { %v713_v43 = vsel %vm561_vm2, %v712_v9, %v708_v30 }
 0x44a   :  { %v1037_v44 = vpop.permute.xlu1 %1036  ;;  %v1040_v11 = vpop.permute.xlu0 %1039  ;;  %v716_v60 = vsel %vm594_vm5, %v713_v43, %v715_v45 }
 0x44b   :  { %v718_v15 = vsel %vm597_vm6, %v716_v60, 0.0  ;;  %v1062_v23 = vrot.slane %v1037_v44, %v2401_v40  ;;  %v1066_v4 = vrot.slane %v1040_v11, %v2404_v33 }
 0x44c   :  { %719 = vadd.xlane.f32.xlu1 %v718_v15 }
 0x44d   :  { %v1067_v28 = vsel %vm561_vm2, %v1066_v4, %v1062_v23  ;;  %v2016_v23 = vld [vmem:[%s2771_s7 + $0x60] sm:$0xff]   ;;  %v2017_v4 = vld [vmem:[%s2771_s7 + $0x98] sm:$0xff]  }
 0x44e   :  { %v1043_v63 = vpop.permute.xlu1 %1042  ;;  %v1046_v51 = vpop.permute.xlu0 %1045 }
 0x44f   :  { %v1071_v52 = vrot.slane %v1043_v63, %v2401_v40  ;;  %v1075_v48 = vrot.slane %v1046_v51, %v2404_v33 }
 0x451   :  { %v1076_v8 = vsel %vm561_vm2, %v1075_v48, %v1071_v52  ;;  %v2013_v48 = vld [vmem:[%s2771_s7 + $0x58] sm:$0xff]  }
 0x452   :  { %v1049_v3 = vpop.permute.xlu1 %1048  ;;  %v1052_v55 = vpop.permute.xlu0 %1051  ;;  %v1095_v20 = vsel %vm590_vm3, %v1076_v8, %v1067_v28  ;;  %v2020_v8 = vld [vmem:[%s2771_s7 + $0xa0] sm:$0xff]   ;;  %v2024_v28 = vld [vmem:[%s2771_s7 + $0x30] sm:$0xff]  }
 0x453   :  { %v1080_v5 = vrot.slane %v1049_v3, %v2401_v40  ;;  %v1084_v6 = vrot.slane %v1052_v55, %v2404_v33  ;;  %v2014_v3 = vld [vmem:[%s2771_s7 + $0x90] sm:$0xff]   ;;  %v2015_v55 = vld [vmem:[%s2771_s7 + $0x18] sm:$0xff]  }
 0x455   :  { %v1085_v14 = vsel %vm561_vm2, %v1084_v6, %v1080_v5  ;;  %v2018_v5 = vld [vmem:[%s2771_s7 + $0x20] sm:$0xff]   ;;  %v2019_v6 = vld [vmem:[%s2771_s7 + $0x68] sm:$0xff]  }
 0x456   :  { %v1055_v16 = vpop.permute.xlu1 %1054  ;;  %v1058_v38 = vpop.permute.xlu0 %1057  ;;  %v1096_v54 = vsel %vm592_vm4, %v1085_v14, %v1095_v20  ;;  %v2021_v14 = vld [vmem:[%s2771_s7 + $0x28] sm:$0xff]   ;;  %v2027_v20 = vld [vmem:[%s2771_s7 + $0x38] sm:$0xff]  }
 0x457   :  { %v1089_v41 = vrot.slane %v1055_v16, %v2401_v40  ;;  %v1093_v32 = vrot.slane %v1058_v38, %v2404_v33  ;;  %v2022_v16 = vld [vmem:[%s2771_s7 + $0x70] sm:$0xff]   ;;  %v2023_v38 = vld [vmem:[%s2771_s7 + $0xa8] sm:$0xff]  }
 0x459   :  { %v1094_v24 = vsel %vm561_vm2, %v1093_v32, %v1089_v41  ;;  %v2025_v41 = vld [vmem:[%s2771_s7 + $0x78] sm:$0xff]   ;;  %v2026_v32 = vld [vmem:[%s2771_s7 + $0xb0] sm:$0xff]  }
 0x45a   :  { %v1097_v26 = vsel %vm594_vm5, %v1094_v24, %v1096_v54  ;;  %v2028_v24 = vld [vmem:[%s2771_s7 + $0xb8] sm:$0xff]  }
 0x45b   :  { %v1099_v35 = vsel %vm597_vm6, %v1097_v26, 0.0 }
 0x45c   :  { %1100 = vadd.xlane.f32.xlu0 %v1099_v35 }
 0x4d9   :  { %v720_v59 = vpop.xlane.xlu1 %719 }
 0x4da   :  { %2077 = vrcp.f32 %v720_v59 }
 0x4e4   :  { %v2078_v9 = vpop.eup %2077 }
 0x4e5   :  { %v726_v34 = vrot.slane %v2078_v9, %v2222_v21  ;;  %v730_v30 = vrot.slane %v2078_v9, %v2279_v39  ;;  %v734_v44 = vrot.slane %v2078_v9, %v2325_v50 }
 0x4e7   :  { %v744_v40 = vmul.f32 %v2454_v31, %v726_v34  ;;  %v743_v33 = vmul.f32 %v2450_v46, %v726_v34  ;;  %v745_v43 = vmul.f32 %v2465_v47, %v730_v30  ;;  %v746_v45 = vmul.f32 %v2463_v37, %v730_v30 }
 0x4e8   :  { %v747_v11 = vmul.f32 %v2474_v49, %v734_v44  ;;  %v748_v31 = vmul.f32 %v2472_v13, %v734_v44  ;;  %v738_v46 = vrot.slane %v2078_v9, %v2344_v18 }
 0x4e9   :  { %758 = vperm.xlu1 %1968, %v744_v40   ;;  %753 = vperm.xlu0 %1967, %v743_v33   ;;  %v1101_v25 = vpop.xlane.xlu0 %1100 }
 0x4ea   :  { %2079 = vrcp.f32 %v1101_v25  ;;  %v749_v60 = vmul.f32 %v2482_v17, %v738_v46  ;;  %v750_v15 = vmul.f32 %v2479_v19, %v738_v46 }
 0x4ed   :  { %763 = vperm.xlu1 %1968, %v745_v43   ;;  %768 = vperm.xlu0 %1967, %v746_v45  }
 0x4f1   :  { %773 = vperm.xlu1 %1968, %v747_v11   ;;  %778 = vperm.xlu0 %1967, %v748_v31  }
 0x4f4   :  { %v2080_v63 = vpop.eup %2079 }
 0x4f5   :  { %783 = vperm.xlu1 %1968, %v749_v60   ;;  %788 = vperm.xlu0 %1967, %v750_v15   ;;  %v1107_v37 = vrot.slane %v2080_v63, %v2222_v21  ;;  %v1111_v49 = vrot.slane %v2080_v63, %v2279_v39  ;;  %v1115_v17 = vrot.slane %v2080_v63, %v2325_v50  ;;  %v2005_v39 = vld [vmem:[%s2771_s7 + $0x40] sm:$0xff]  }
 0x4f6   :  { %1833 = vmatprep.subr.bf16.mxu0 %v2005_v39 }
 0x4f7   :  { %v1125_v47 = vmul.f32 %v2488_v57, %v1107_v37  ;;  %v1124_v51 = vmul.f32 %v2486_v56, %v1107_v37  ;;  %v1127_v13 = vmul.f32 %v2494_v27, %v1111_v49  ;;  %v1126_v52 = vmul.f32 %v2492_v10, %v1111_v49  ;;  %v2006_v56 = vld [vmem:[%s2771_s7] sm:$0xff]  }
 0x4f8   :  { %v1129_v19 = vmul.f32 %v2500_v62, %v1115_v17  ;;  %v1128_v21 = vmul.f32 %v2498_v61, %v1115_v17  ;;  %v1119_v57 = vrot.slane %v2080_v63, %v2344_v18  ;;  %1834 = vmatpush3.bf16.msra.mxu0 %v2006_v56  ;;  %v2007_v18 = vld [vmem:[%s2771_s7 + $0x48] sm:$0xff]   ;;  %v2008_v27 = vld [vmem:[%s2771_s7 + $0x80] sm:$0xff]   ;;  %v2010_v62 = vld [vmem:[%s2771_s7 + $0x50] sm:$0xff]  }
 0x4f9   :  { %1139 = vperm.xlu0 %1967, %v1125_v47   ;;  %1134 = vperm.xlu1 %1968, %v1124_v51   ;;  %v2009_v61 = vld [vmem:[%s2771_s7 + $0x8] sm:$0xff]  }
 0x4fa   :  { %v1131_v50 = vmul.f32 %v2506_v2, %v1119_v57  ;;  %v1130_v10 = vmul.f32 %v2504_v1, %v1119_v57  ;;  %1835 = vmatprep.subr.bf16.mxu0 %v2007_v18  ;;  %1903 = vmatpush3.bf16.msra.mxu1 %v2008_v27  ;;  %v2011_v1 = vld [vmem:[%s2771_s7 + $0x88] sm:$0xff]   ;;  %v2012_v2 = vld [vmem:[%s2771_s7 + $0x10] sm:$0xff]  }
 0x4fb   :  { %1904 = vmatprep.subr.bf16.mxu1 %v2081_v0 }
 0x4fc   :  { %1836 = vmatpush3.bf16.msra.mxu0 %v2009_v61 }
 0x4fd   :  { %1149 = vperm.xlu0 %1967, %v1127_v13   ;;  %1144 = vperm.xlu1 %1968, %v1126_v52  }
 0x4fe   :  { %1837 = vmatprep.subr.bf16.mxu0 %v2010_v62  ;;  %1905 = vmatpush3.bf16.msra.mxu1 %v2011_v1 }
 0x4ff   :  { %1906 = vmatprep.subr.bf16.mxu1 %v2081_v0 }
 0x500   :  { %1838 = vmatpush3.bf16.msra.mxu0 %v2012_v2 }
 0x501   :  { %1159 = vperm.xlu0 %1967, %v1129_v19   ;;  %1154 = vperm.xlu1 %1968, %v1128_v21  }
 0x502   :  { %1839 = vmatprep.subr.bf16.mxu0 %v2013_v48  ;;  %1907 = vmatpush3.bf16.msra.mxu1 %v2014_v3 }
 0x503   :  { %1908 = vmatprep.subr.bf16.mxu1 %v2081_v0 }
 0x504   :  { %1840 = vmatpush3.bf16.msra.mxu0 %v2015_v55 }
 0x505   :  { %1169 = vperm.xlu0 %1967, %v1131_v50   ;;  %1164 = vperm.xlu1 %1968, %v1130_v10  }
 0x506   :  { %1841 = vmatprep.subr.bf16.mxu0 %v2016_v23  ;;  %1909 = vmatpush3.bf16.msra.mxu1 %v2017_v4 }
 0x507   :  { %1910 = vmatprep.subr.bf16.mxu1 %v2081_v0 }
 0x508   :  { %1842 = vmatpush3.bf16.msra.mxu0 %v2018_v5 }
 0x509   :  { %1843 = vmatprep.subr.bf16.mxu0 %v2019_v6 }
 0x50a   :  { %1911 = vmatpush3.bf16.msra.mxu1 %v2020_v8 }
 0x50b   :  { %1912 = vmatprep.subr.bf16.mxu1 %v2081_v0 }
 0x50c   :  { %1844 = vmatpush3.bf16.msra.mxu0 %v2021_v14 }
 0x50d   :  { %1845 = vmatprep.subr.bf16.mxu0 %v2022_v16 }
 0x50e   :  { %1913 = vmatpush3.bf16.msra.mxu1 %v2023_v38 }
 0x50f   :  { %1914 = vmatprep.subr.bf16.mxu1 %v2081_v0 }
 0x510   :  { %1846 = vmatpush3.bf16.msra.mxu0 %v2024_v28 }
 0x511   :  { %1847 = vmatprep.subr.bf16.mxu0 %v2025_v41 }
 0x512   :  { %1915 = vmatpush3.bf16.msra.mxu1 %v2026_v32 }
 0x513   :  { %1916 = vmatprep.subr.bf16.mxu1 %v2081_v0 }
 0x514   :  { %1848 = vmatpush3.bf16.msra.mxu0 %v2027_v20 }
 0x515   :  { %1922 = vmatprep.subr.bf16.mxu0 %v2081_v0 }
 0x516   :  { %1917 = vmatpush3.bf16.msra.mxu1 %v2028_v24 }
 0x517   :  { %1942 = vmatprep.subr.bf16.mxu1 %v2081_v0 }
 0x568   :  { %v759_v54 = vpop.permute.xlu1 %758  ;;  %v754_v26 = vpop.permute.xlu0 %753 }
 0x569   :  { %v792_v35 = vmul.f32 %v759_v54, %v2292_v58  ;;  %v791_v59 = vmul.f32 %v754_v26, %v2290_v53 }
 0x56b   :  { %v800_v9 = vsel %vm424_vm1, %v792_v35, 0.0  ;;  %v799_v34 = vsel %vm424_vm1, %v791_v59, 0.0 }
 0x56c   :  { %v801_v40 = vadd.f32 %v800_v9, %v799_v34  ;;  %v764_v33 = vpop.permute.xlu1 %763  ;;  %v769_v30 = vpop.permute.xlu0 %768 }
 0x56d   :  { %v793_v25 = vmul.f32 %v764_v33, %v2298_v7  ;;  %v794_v43 = vmul.f32 %v769_v30, %v2300_v12 }
 0x56e   :  { %v802_v45 = vrot.slane %v801_v40, 4 }
 0x56f   :  { %v808_v44 = vsel %vm424_vm1, %v793_v25, 0.0  ;;  %v809_v11 = vsel %vm424_vm1, %v794_v43, 0.0 }
 0x570   :  { %v803_v31 = vadd.f32 %v802_v45, %v801_v40  ;;  %v810_v46 = vadd.f32 %v809_v11, %v808_v44  ;;  %v774_v60 = vpop.permute.xlu1 %773  ;;  %v779_v15 = vpop.permute.xlu0 %778 }
 0x571   :  { %v795_v63 = vmul.f32 %v774_v60, %v2304_v22  ;;  %v796_v37 = vmul.f32 %v779_v15, %v2306_v29 }
 0x572   :  { %v804_v47 = vrot.slane %v803_v31, 2  ;;  %v811_v51 = vrot.slane %v810_v46, 4 }
 0x573   :  { %v817_v49 = vsel %vm424_vm1, %v795_v63, 0.0  ;;  %v818_v13 = vsel %vm424_vm1, %v796_v37, 0.0 }
 0x574   :  { %v805_v52 = vadd.f32 %v804_v47, %v803_v31  ;;  %v812_v17 = vadd.f32 %v811_v51, %v810_v46  ;;  %v819_v19 = vadd.f32 %v818_v13, %v817_v49  ;;  %v784_v21 = vpop.permute.xlu1 %783  ;;  %v789_v57 = vpop.permute.xlu0 %788 }
 0x575   :  { %v797_v39 = vmul.f32 %v784_v21, %v2309_v36  ;;  %v798_v56 = vmul.f32 %v789_v57, %v2312_v42 }
 0x576   :  { %v813_v50 = vrot.slane %v812_v17, 2  ;;  %v820_v10 = vrot.slane %v819_v19, 4  ;;  %v806_v18 = vrot.slane %v805_v52, 1 }
 0x577   :  { %v826_v27 = vsel %vm424_vm1, %v797_v39, 0.0  ;;  %v827_v61 = vsel %vm424_vm1, %v798_v56, 0.0 }
 0x578   :  { %v814_v62 = vadd.f32 %v813_v50, %v812_v17  ;;  %v821_v1 = vadd.f32 %v820_v10, %v819_v19  ;;  %v828_v2 = vadd.f32 %v827_v61, %v826_v27  ;;  %v1135_v48 = vpop.permute.xlu1 %1134  ;;  %v1140_v3 = vpop.permute.xlu0 %1139  ;;  %v807_v8 = vadd.f32 %v806_v18, %v805_v52 }
 0x579   :  { %v1172_v55 = vmul.f32 %v1135_v48, %v2290_v53  ;;  %v1173_v23 = vmul.f32 %v1140_v3, %v2292_v58 }
 0x57a   :  { %v815_v4 = vrot.slane %v814_v62, 1  ;;  %v822_v5 = vrot.slane %v821_v1, 2  ;;  %v829_v6 = vrot.slane %v828_v2, 4 }
 0x57b   :  { %v1181_v14 = vsel %vm1180_vm7, %v1172_v55, 0.0  ;;  %v1182_v16 = vsel %vm1180_vm7, %v1173_v23, 0.0 }
 0x57c   :  { %v816_v38 = vadd.f32 %v815_v4, %v814_v62  ;;  %v823_v28 = vadd.f32 %v822_v5, %v821_v1  ;;  %v830_v41 = vadd.f32 %v829_v6, %v828_v2  ;;  %v1183_v32 = vadd.f32 %v1182_v16, %v1181_v14  ;;  %v1145_v20 = vpop.permute.xlu1 %1144  ;;  %v1150_v24 = vpop.permute.xlu0 %1149 }
 0x57d   :  { %v1174_v54 = vmul.f32 %v1145_v20, %v2298_v7  ;;  %v1175_v53 = vmul.f32 %v1150_v24, %v2300_v12 }
 0x57e   :  { %v1221_v58 = vsel %vm590_vm3, %v816_v38, %v807_v8  ;;  %v824_v26 = vrot.slane %v823_v28, 1  ;;  %v831_v35 = vrot.slane %v830_v41, 2  ;;  %v1184_v59 = vrot.slane %v1183_v32, 4 }
 0x57f   :  { %v1190_v9 = vsel %vm1180_vm7, %v1174_v54, 0.0  ;;  %v1191_v34 = vsel %vm1180_vm7, %v1175_v53, 0.0  ;;  %v2030_v54 = vld [vmem:[%s2772_s9 + $0x8] sm:$0xff]   ;;  %v2031_v53 = vld [vmem:[%s2772_s9 + $0x10] sm:$0xff]  }
 0x580   :  { %v825_v40 = vadd.f32 %v824_v26, %v823_v28  ;;  %v832_v33 = vadd.f32 %v831_v35, %v830_v41  ;;  %v1185_v30 = vadd.f32 %v1184_v59, %v1183_v32  ;;  %v1192_v25 = vadd.f32 %v1191_v34, %v1190_v9  ;;  %v1155_v43 = vpop.permute.xlu1 %1154  ;;  %v1160_v45 = vpop.permute.xlu0 %1159  ;;  %v2029_v41 = vld [vmem:[%s2772_s9] sm:$0xff]   ;;  %v2034_v35 = vld [vmem:[%s2772_s9 + $0x28] sm:$0xff]   ;;  %v2035_v59 = vld [vmem:[%s2772_s9 + $0x30] sm:$0xff]  }
 0x581   :  { %v1176_v44 = vmul.f32 %v1155_v43, %v2304_v22  ;;  %v1177_v7 = vmul.f32 %v1160_v45, %v2306_v29  ;;  %v2033_v26 = vld [vmem:[%s2772_s9 + $0x20] sm:$0xff]   ;;  %v2036_v9 = vld [vmem:[%s2772_s9 + $0x38] sm:$0xff]   ;;  %v2042_v43 = vld [vmem:[%s2773_s11 + $0x28] sm:$0xff]  }
 0x582   :  { %v833_v12 = vrot.slane %v832_v33, 1  ;;  %v1186_v11 = vrot.slane %v1185_v30, 2  ;;  %v1193_v31 = vrot.slane %v1192_v25, 4  ;;  %v1222_v46 = vsel %vm592_vm4, %v825_v40, %v1221_v58  ;;  %v2032_v58 = vld [vmem:[%s2772_s9 + $0x18] sm:$0xff]   ;;  %v2037_v34 = vld [vmem:[%s2773_s11] sm:$0xff]   ;;  %v2038_v40 = vld [vmem:[%s2773_s11 + $0x8] sm:$0xff]  }
 0x583   :  { %v1199_v60 = vsel %vm1180_vm7, %v1176_v44, 0.0  ;;  %v1200_v15 = vsel %vm1180_vm7, %v1177_v7, 0.0  ;;  %v1781_v7 = vld [vmem:[%s2774_s8] ss:$0 sm:$0xff] }
 0x584   :  { %v834_v63 = vadd.f32 %v833_v12, %v832_v33  ;;  %v1187_v37 = vadd.f32 %v1186_v11, %v1185_v30  ;;  %v1194_v47 = vadd.f32 %v1193_v31, %v1192_v25  ;;  %v1201_v51 = vadd.f32 %v1200_v15, %v1199_v60  ;;  %v1165_v49 = vpop.permute.xlu1 %1164  ;;  %v1170_v13 = vpop.permute.xlu0 %1169  ;;  %v2039_v33 = vld [vmem:[%s2773_s11 + $0x10] sm:$0xff]   ;;  %v2040_v30 = vld [vmem:[%s2773_s11 + $0x18] sm:$0xff]   ;;  %v2041_v25 = vld [vmem:[%s2773_s11 + $0x20] sm:$0xff]  }
 0x585   :  { %v1178_v52 = vmul.f32 %v1165_v49, %v2309_v36  ;;  %v1179_v22 = vmul.f32 %v1170_v13, %v2312_v42  ;;  %v2043_v13 = vld [vmem:[%s2773_s11 + $0x30] sm:$0xff]  }
 0x586   :  { %v1195_v29 = vrot.slane %v1194_v47, 2  ;;  %v1202_v17 = vrot.slane %v1201_v51, 4  ;;  %v1223_v19 = vsel %vm594_vm5, %v834_v63, %v1222_v46  ;;  %v1188_v39 = vrot.slane %v1187_v37, 1 }
 0x587   :  { %v1208_v21 = vsel %vm1180_vm7, %v1178_v52, 0.0  ;;  %v1209_v57 = vsel %vm1180_vm7, %v1179_v22, 0.0  ;;  %v2044_v52 = vld [vmem:[%s2773_s11 + $0x38] sm:$0xff]   ;;  %v1806_v22 = vld [vmem:[%s2775_s10] ss:$0 sm:$0xff] }
 0x588   :  { %v1196_v56 = vadd.f32 %v1195_v29, %v1194_v47  ;;  %v1203_v50 = vadd.f32 %v1202_v17, %v1201_v51  ;;  %v1210_v10 = vadd.f32 %v1209_v57, %v1208_v21  ;;  %v1189_v62 = vadd.f32 %v1188_v39, %v1187_v37 }
 0x58a   :  { %v1197_v18 = vrot.slane %v1196_v56, 1  ;;  %v1204_v27 = vrot.slane %v1203_v50, 2  ;;  %v1211_v61 = vrot.slane %v1210_v10, 4 }
 0x58c   :  { %v1198_v1 = vadd.f32 %v1197_v18, %v1196_v56  ;;  %v1205_v36 = vadd.f32 %v1204_v27, %v1203_v50  ;;  %v1212_v2 = vadd.f32 %v1211_v61, %v1210_v10  ;;  %v1815_v50 = vld [vmem:[%s2776_s12] ss:$0 sm:$0xff] }
 0x58e   :  { %v1229_v42 = vsel %vm590_vm3, %v1198_v1, %v1189_v62  ;;  %v1206_v48 = vrot.slane %v1205_v36, 1  ;;  %v1213_v3 = vrot.slane %v1212_v2, 2 }
 0x590   :  { %v1207_v55 = vadd.f32 %v1206_v48, %v1205_v36  ;;  %v1214_v23 = vadd.f32 %v1213_v3, %v1212_v2 }
 0x592   :  { %v1215_v4 = vrot.slane %v1214_v23, 1  ;;  %v1230_v5 = vsel %vm592_vm4, %v1207_v55, %v1229_v42 }
 0x594   :  { %v1216_v6 = vadd.f32 %v1215_v4, %v1214_v23 }
 0x596   :  { %v1231_v8 = vsel %vm594_vm5, %v1216_v6, %v1230_v5 }
 0x597   :  { %v1233_v14 = vsel %vm424_vm1, %v1223_v19, %v1231_v8 }
 0x598   :  { %v1235_v16 = vrot.slane %v1233_v14, 2  ;;  %v1239_v32 = vpack.c.bf16 %v1233_v14, %v1233_v14 }
 0x59a   :  { %v1237_v38 = vsub.f32 %v1233_v14, %v1235_v16  ;;  %v1240_v28 = vpack.c.bf16 %v1235_v16, %v1235_v16 }
 0x59c   :  { %v1238_v20 = vand.u32 2147483647, %v1237_v38  ;;  %1473 = vmatprep.mubr.bf16.mxu0 %v1240_v28 }
 0x59d   :  { %1474 = vmatmul.mubr.bf16.vlgmr.msra.gmra.mrb[4].mxu0 %v1239_v32 }
 0x59e   :  { %v1241_v24 = vpack.c.bf16 %v1238_v20, %v1238_v20  ;;  %1923 = vmatpush3.bf16.msra.mxu0 %v2029_v41  ;;  %1938 = vmatprep.mubr.msk.bf16.mxu0 %vm2082_vm0, %v2081_v0 }
 0x59f   :  { %1924 = vmatprep.subr.bf16.mxu0 %v2081_v0 }
 0x5a0   :  { %1919 = vmatmul.mubr.bf16.vlgmr.msra.gmra.mrb[16].mxu1 %v1241_v24 }
 0x5a1   :  { %1958 = vmatprep.mubr.msk.bf16.mxu1 %vm2082_vm0, %v2081_v0  ;;  %1943 = vmatpush3.bf16.msra.mxu1 %v2037_v34 }
 0x5a2   :  { %1925 = vmatpush3.bf16.msra.mxu0 %v2030_v54  ;;  %1944 = vmatprep.subr.bf16.mxu1 %v2081_v0 }
 0x5a3   :  { %1926 = vmatprep.subr.bf16.mxu0 %v2081_v0 }
 0x5a5   :  { %1945 = vmatpush3.bf16.msra.mxu1 %v2038_v40 }
 0x5a6   :  { %1927 = vmatpush3.bf16.msra.mxu0 %v2031_v53  ;;  %1946 = vmatprep.subr.bf16.mxu1 %v2081_v0 }
 0x5a7   :  { %1928 = vmatprep.subr.bf16.mxu0 %v2081_v0 }
 0x5a9   :  { %1947 = vmatpush3.bf16.msra.mxu1 %v2039_v33 }
 0x5aa   :  { %1929 = vmatpush3.bf16.msra.mxu0 %v2032_v58  ;;  %1948 = vmatprep.subr.bf16.mxu1 %v2081_v0 }
 0x5ab   :  { %1930 = vmatprep.subr.bf16.mxu0 %v2081_v0 }
 0x5ad   :  { %1949 = vmatpush3.bf16.msra.mxu1 %v2040_v30 }
 0x5ae   :  { %1931 = vmatpush3.bf16.msra.mxu0 %v2033_v26  ;;  %1950 = vmatprep.subr.bf16.mxu1 %v2081_v0 }
 0x5af   :  { %1932 = vmatprep.subr.bf16.mxu0 %v2081_v0 }
 0x5b1   :  { %1951 = vmatpush3.bf16.msra.mxu1 %v2041_v25 }
 0x5b2   :  { %1933 = vmatpush3.bf16.msra.mxu0 %v2034_v35  ;;  %1952 = vmatprep.subr.bf16.mxu1 %v2081_v0 }
 0x5b3   :  { %1934 = vmatprep.subr.bf16.mxu0 %v2081_v0 }
 0x5b5   :  { %1953 = vmatpush3.bf16.msra.mxu1 %v2042_v43 }
 0x5b6   :  { %1935 = vmatpush3.bf16.msra.mxu0 %v2035_v59  ;;  %1954 = vmatprep.subr.bf16.mxu1 %v2081_v0 }
 0x5b7   :  { %1936 = vmatprep.subr.bf16.mxu0 %v2081_v0 }
 0x5b9   :  { %1955 = vmatpush3.bf16.msra.mxu1 %v2043_v13 }
 0x5ba   :  { %1937 = vmatpush3.bf16.msra.mxu0 %v2036_v9  ;;  %1956 = vmatprep.subr.bf16.mxu1 %v2081_v0 }
 0x5bd   :  { %1957 = vmatpush3.bf16.msra.mxu1 %v2044_v52 }
 0x670   :  { %v1849_v45 = vpop.f32.mrb[4].mxu0 }
 0x671   :  { %v1850_v44 = vpop.f32.mrb[5].mxu0 }
 0x672   :  { %v1851_v12 = vadd.f32 %v1850_v44, %v1849_v45  ;;  %v1852_v11 = vpop.f32.mrb[6].mxu0 }
 0x673   :  { %v1853_v31 = vpop.f32.mrb[7].mxu0  ;;  %v1515_v46 = vpop.f32.mrb[16].mxu1 }
 0x674   :  { %v1476_v60 = vadd.f32 %v1851_v12, %v1781_v7  ;;  %v1920_v15 = vpop.f32.mrb[17].mxu1 }
 0x675   :  { %v1518_v63 = vpop.f32.mrb[18].mxu1 }
 0x676   :  { %v1516_v37 = vadd.f32 %v1515_v46, %v1476_v60  ;;  %v1921_v47 = vpop.f32.mrb[19].mxu1 }
 0x678   :  { %v1521_v51 = vmax.f32 %v1516_v37, 0.0 }
 0x67a   :  { %v1522_v49 = vpack.c.bf16 %v1521_v51, %v1521_v51 }
 0x67c   :  { %1939 = vmatmul.mubr.bf16.vlgmr.msra.gmra.mrb[8].mxu0 %v1522_v49 }
 0x74f   :  { %v1628_v29 = vpop.f32.mrb[8].mxu0 }
 0x750   :  { %v1629_v17 = vadd.f32 %v1806_v22, %v1628_v29  ;;  %v1940_v19 = vpop.f32.mrb[9].mxu0 }
 0x751   :  { %v1631_v21 = vpop.f32.mrb[10].mxu0 }
 0x752   :  { %v1634_v57 = vmax.f32 %v1629_v17, 0.0  ;;  %v1941_v39 = vpop.f32.mrb[11].mxu0 }
 0x754   :  { %v1635_v56 = vpack.c.bf16 %v1634_v57, %v1634_v57 }
 0x756   :  { %1959 = vmatmul.mubr.bf16.vlgmr.msra.gmra.mrb[20].mxu1 %v1635_v56 }
 0x829   :  { %v1741_v10 = vpop.f32.mrb[20].mxu1 }
 0x82a   :  { %v1742_v18 = vadd.f32 %v1815_v50, %v1741_v10  ;;  %v1960_v0 = vpop.f32.mrb[21].mxu1 }
 0x82b   :  { %v1744_v27 = vpop.f32.mrb[22].mxu1 }
 0x82c   :  { %1747 = vst [vmem:[%s2777_s13] sm:$0x3] %v1742_v18  ;;  %v1961_v61 = vpop.f32.mrb[23].mxu1 }

</bundles_post_ra>
